<compile_context>
chip_gen: v7x
topology: tpu7x:2x2x1
jax: 0.10.0
libtpu: 0.0.40
codegen_flags: <defaults>
</compile_context>

<pallas_src>
import jax
import jax.numpy as jnp
from jax.experimental import pallas as pl
from jax.experimental.pallas import tpu as pltpu


def _round_up(x, m):
    return ((x + m - 1) // m) * m


def _pad_hidden(h):
    """Pad hidden to a lane-dense multiple of 128; bump to a 256 multiple when the
    relative padding cost is tiny (matches the 256x256 MXU tile on v6e/v7x)."""
    hp = _round_up(h, 128)
    if hp >= 2048 and hp % 256:
        hp += 128
    return hp


def _vmem_budget_bytes():
    """Usable per-TensorCore VMEM budget.  Falls back to 64 MiB (valid on every
    generation: v7x has 64 MiB/TC, v5e/v6e have 128 MiB)."""
    cap = 64 * 1024 * 1024
    try:
        cap = int(getattr(pltpu.get_tpu_info(), "vmem_capacity_bytes", cap))
    except Exception:
        pass
    return int(cap * 0.85)  # headroom for Mosaic internal scratch


def _largest_divisor_tile(total, below, floor):
    """Largest multiple-of-128 divisor of `total` that is < below and >= floor."""
    best = None
    d = floor
    while d < below:
        if total % d == 0:
            best = d
        d += 128
    return best


def prepare_resblock_params(weight, bias, *, param_dtype=None):
    """One-time parameter prep (hoisted out of the per-call forward path).

    weight: (H, H) PyTorch nn.Linear layout (out_features, in_features).
    bias:   (H,)
    param_dtype: optional cast (e.g. jnp.bfloat16) -- ~2-3x MXU throughput and
        half the weight HBM/VMEM traffic on v5e/v6e/v7x when precision allows.

    Returns (wt, b2d, H): wt is the (Hp, Hp) zero-padded, pre-transposed weight so
    the kernel computes a plain `x @ wt` (== x @ W.T); b2d is the (1, Hp) bias.
    """
    H = int(weight.shape[0])
    assert weight.shape == (H, H) and bias.shape == (H,)
    if param_dtype is not None:
        weight = weight.astype(param_dtype)
        bias = bias.astype(param_dtype)
    Hp = _pad_hidden(H)
    wt = weight.T                                   # (in, out)
    if Hp != H:
        wt = jnp.pad(wt, ((0, Hp - H), (0, Hp - H)))
        bias = jnp.pad(bias, (0, Hp - H))
    return wt, bias.reshape(1, Hp), H


def _resblock_kernel(x_ref, wt_ref, b_ref, o_ref):
    """One (row tile, weight-column tile) block of out = x + silu(x @ wt + b).

    x_ref : (tm, Hp)   input row tile (full contraction width), native dtype
    wt_ref: (Hp, tn)   pre-transposed weight column block, native dtype
    b_ref : (1, tn)    bias slice
    o_ref : (tm, tn)   output block
    """
    x = x_ref[...]
    cdt = wt_ref.dtype
    xm = x if x.dtype == cdt else x.astype(cdt)
    prec = jax.lax.Precision.HIGHEST if cdt == jnp.float32 else None

    # Linear: y = x @ W.T + b  (MXU, native-dtype operands, f32 accumulator).
    y = jnp.dot(xm, wt_ref[...], preferred_element_type=jnp.float32,
                precision=prec)
    y = y + b_ref[...].astype(jnp.float32)

    # SiLU: y * sigmoid(y); sigmoid via tanh -> EUP slot, numerically stable.
    act = y * (0.5 * jnp.tanh(0.5 * y) + 0.5)

    # Residual slice of x matching this output column block.
    tn = o_ref.shape[1]
    if tn == x_ref.shape[1]:
        x_res = x
    else:
        col0 = pl.multiple_of(pl.program_id(0) * tn, 128)
        x_res = x_ref[:, pl.ds(col0, tn)]

    if o_ref.dtype == jnp.float32:
        o_ref[...] = x_res.astype(jnp.float32) + act
    else:
        # bf16/f16 output: add in the output dtype (one cast, lighter epilogue).
        o_ref[...] = x_res + act.astype(o_ref.dtype)


def _plan_tiles(rows, Hp, x_elem, w_elem, budget, row_tile):
    """Choose (tm, tn) so the double-buffered footprint fits `budget`.
    tn always divides Hp (so the residual slice is in-bounds and lane-aligned)."""
    tm = min(_round_up(max(row_tile, 8), 8), _round_up(max(rows, 1), 8))
    tn = Hp

    def est(tm_, tn_):
        return (2 * Hp * tn_ * w_elem      # weight column block (2 pipeline buffers)
                + 2 * tm_ * Hp * x_elem    # x row tile (2 buffers)
                + 2 * tm_ * tn_ * x_elem   # output tile (2 buffers)
                + 2 * tn_ * w_elem         # bias
                + tm_ * Hp * 4             # possible in-kernel operand cast of x
                + 4 * tm_ * tn_ * 4        # f32 epilogue temporaries (y, sigmoid, act)
                + (2 << 20))               # slack for Mosaic internal scratch

    # Shrink the weight-column tile first (keeps x streaming cheap), then rows.
    for tn_floor, tm_floor in ((512, 128), (128, 8)):
        while est(tm, tn) > budget and tn > tn_floor:
            nxt = _largest_divisor_tile(Hp, tn, tn_floor)
            if nxt is None:
                break
            tn = nxt
        while est(tm, tn) > budget and tm > tm_floor:
            tm = max(tm_floor, _round_up(tm // 2, 8))

    # Keep >= 2 grid blocks when the problem allows it, so both v7x TensorCores
    # (megacore) get work even for single-tile shapes.
    if pl.cdiv(max(rows, 1), tm) == 1 and Hp // tn == 1:
        if rows >= 16:
            tm = _round_up(pl.cdiv(rows, 2), 8)
        else:
            nxt = _largest_divisor_tile(Hp, Hp, 128)
            if nxt is not None:
                tn = nxt

    return tm, tn, est(tm, tn)


def resblock_forward(x, params, *, row_tile=512):
    """Apply ResBlock to x of shape (..., H) using prepared params.

    params: output of prepare_resblock_params(weight, bias).
    row_tile: max rows per grid step (large tiles amortize grid-step overhead;
              the planner shrinks it automatically to fit VMEM).
    """
    wt, b2d, H = params
    Hp = wt.shape[0]
    orig_shape = x.shape
    assert orig_shape[-1] == H, "hidden dim mismatch"

    x2d = x.reshape(-1, H)                           # (rows, H)
    rows = x2d.shape[0]
    if Hp != H:
        # zero-pad the contraction/lane dim only; rows stay ragged (no row padding).
        x2d = jnp.pad(x2d, ((0, 0), (0, Hp - H)))

    x_elem = jnp.dtype(x.dtype).itemsize
    w_elem = jnp.dtype(wt.dtype).itemsize
    budget = _vmem_budget_bytes()
    tm, tn, footprint = _plan_tiles(rows, Hp, x_elem, w_elem, budget, row_tile)
    grid_n = Hp // tn                                # tn divides Hp by construction
    grid_m = pl.cdiv(rows, tm)                       # ragged last row block is fine
    vmem_limit = int(min(budget, max(footprint, 32 * 1024 * 1024)))

    out2d = pl.pallas_call(
        _resblock_kernel,
        out_shape=jax.ShapeDtypeStruct((rows, Hp), x.dtype),
        grid_spec=pltpu.PrefetchScalarGridSpec(
            num_scalar_prefetch=0,
            # Row axis innermost: the weight column block is constant across the
            # inner steps, so it is DMA'd once per column tile.
            grid=(grid_n, grid_m),
            in_specs=[
                pl.BlockSpec((tm, Hp), lambda n, i: (i, 0)),   # x row tile
                pl.BlockSpec((Hp, tn), lambda n, i: (0, n)),   # weight column block
                pl.BlockSpec((1, tn), lambda n, i: (0, n)),    # bias slice
            ],
            out_specs=pl.BlockSpec((tm, tn), lambda n, i: (i, n)),
        ),
        compiler_params=pltpu.CompilerParams(
            dimension_semantics=("parallel", "parallel"),
            vmem_limit_bytes=vmem_limit),
    )(x2d, wt, b2d)

    out2d = out2d if Hp == H else out2d[:, :H]
    return out2d.reshape(orig_shape)


def _reference(x, weight, bias):
    y = jnp.einsum("...i,oi->...o", x, weight) + bias
    return x + jax.nn.silu(y)


if __name__ == "__main__":
    # Small shapes implied by the module: (batch, seq, hidden)
    B, S, H = 2, 8, 32
    key = jax.random.PRNGKey(0)
    kx, kb, kw = jax.random.split(key, 3)

    x = jax.random.normal(kx, (B, S, H), dtype=jnp.float32)

    # Parameters per __init__: weight zero-init, bias ~ U(-1/sqrt(H), 1/sqrt(H))
    weight = jnp.zeros((H, H), dtype=jnp.float32)
    bound = 1.0 / (H ** 0.5)
    bias = jax.random.uniform(kb, (H,), dtype=jnp.float32,
                              minval=-bound, maxval=bound)

    params = prepare_resblock_params(weight, bias)   # one-time prep (pad + transpose)
    out = jax.block_until_ready(resblock_forward(x, params))
    ref = _reference(x, weight, bias)
    assert out.shape == x.shape
    assert jnp.allclose(out, ref, atol=1e-5, rtol=1e-5), "mismatch (zero weight)"

    # Exercise the MXU path with a nonzero weight as well (same forward math).
    weight_rnd = jax.random.normal(kw, (H, H), dtype=jnp.float32) * 0.05
    params_rnd = prepare_resblock_params(weight_rnd, bias)
    out2 = jax.block_until_ready(resblock_forward(x, params_rnd))
    ref2 = _reference(x, weight_rnd, bias)
    assert jnp.allclose(out2, ref2, atol=1e-5, rtol=1e-5), "mismatch (random weight)"

    print("KERNEL_OK")
</pallas_src>

<mosaic_0001>
module attributes {stable_mosaic.version = 11 : i64} {
  func.func @_resblock_kernel(%arg0: i32, %arg1: i32, %arg2: memref<8x128xf32, #tpu.memory_space<vmem>>, %arg3: memref<128x128xf32, #tpu.memory_space<vmem>>, %arg4: memref<1x128xf32, #tpu.memory_space<vmem>>, %arg5: memref<8x128xf32, #tpu.memory_space<vmem>>) attributes {dimension_semantics = [#tpu.dimension_semantics<parallel>, #tpu.dimension_semantics<parallel>], iteration_bounds = array<i64: 1, 2>, scalar_prefetch = 0 : i64, scratch_operands = 0 : i64, tpu.core_type = #tpu.core_type<tc>, window_params = [{transform_indices = @transform_0, window_bounds = array<i64: 8, 128>}, {transform_indices = @transform_1, window_bounds = array<i64: 128, 128>}, {transform_indices = @transform_2, window_bounds = array<i64: 1, 128>}, {transform_indices = @transform_3, window_bounds = array<i64: 8, 128>}]} {
    %c0 = arith.constant 0 : index
    %c0_0 = arith.constant 0 : index
    %0 = vector.load %arg2[%c0, %c0_0] : memref<8x128xf32, #tpu.memory_space<vmem>>, vector<8x128xf32>
    %c0_1 = arith.constant 0 : index
    %c0_2 = arith.constant 0 : index
    %1 = vector.load %arg3[%c0_1, %c0_2] : memref<128x128xf32, #tpu.memory_space<vmem>>, vector<128x128xf32>
    %cst = arith.constant dense<0.000000e+00> : vector<8x128xf32>
    %2 = tpu.matmul %0, %1, %cst {dimension_numbers = #tpu.dot_dimension_numbers<[1], [0], [0], [1], [0, 0, 1, 1], [], []>, precision = #tpu.contract_precision<fp32>} : vector<8x128xf32>, vector<128x128xf32>, vector<8x128xf32> -> vector<8x128xf32>
    %c0_3 = arith.constant 0 : index
    %c0_4 = arith.constant 0 : index
    %3 = vector.load %arg4[%c0_3, %c0_4] : memref<1x128xf32, #tpu.memory_space<vmem>>, vector<1x128xf32>
    %4 = vector.broadcast %3 : vector<1x128xf32> to vector<8x128xf32>
    %5 = arith.addf %2, %4 : vector<8x128xf32>
    %cst_5 = arith.constant 5.000000e-01 : f32
    %6 = vector.broadcast %cst_5 : f32 to vector<8x128xf32>
    %7 = arith.mulf %6, %5 : vector<8x128xf32>
    %8 = math.tanh %7 : vector<8x128xf32>
    %cst_6 = arith.constant 5.000000e-01 : f32
    %9 = vector.broadcast %cst_6 : f32 to vector<8x128xf32>
    %10 = arith.mulf %9, %8 : vector<8x128xf32>
    %cst_7 = arith.constant 5.000000e-01 : f32
    %11 = vector.broadcast %cst_7 : f32 to vector<8x128xf32>
    %12 = arith.addf %10, %11 : vector<8x128xf32>
    %13 = arith.mulf %5, %12 : vector<8x128xf32>
    %14 = arith.addf %0, %13 : vector<8x128xf32>
    %c0_8 = arith.constant 0 : index
    %c0_9 = arith.constant 0 : index
    %15 = vector.load %arg5[%c0_8, %c0_9] : memref<8x128xf32, #tpu.memory_space<vmem>>, vector<8x128xf32>
    tpu.vector_store %arg5[%c0_8, %c0_9], %14 {strides = array<i32>} : memref<8x128xf32, #tpu.memory_space<vmem>>, vector<8x128xf32>,
    return
  }
  func.func @transform_0(%arg0: i32, %arg1: i32) -> (i32, i32) {
    %c0_i32 = arith.constant 0 : i32
    %c0_i32_0 = arith.constant 0 : i32
    return %arg1, %c0_i32 : i32, i32
  }
  func.func @transform_1(%arg0: i32, %arg1: i32) -> (i32, i32) {
    %c0_i32 = arith.constant 0 : i32
    %c0_i32_0 = arith.constant 0 : i32
    return %c0_i32, %arg0 : i32, i32
  }
  func.func @transform_2(%arg0: i32, %arg1: i32) -> (i32, i32) {
    %c0_i32 = arith.constant 0 : i32
    %c0_i32_0 = arith.constant 0 : i32
    return %c0_i32, %arg0 : i32, i32
  }
  func.func @transform_3(%arg0: i32, %arg1: i32) -> (i32, i32) {
    %c0_i32 = arith.constant 0 : i32
    return %arg1, %arg0 : i32, i32
  }
}

</mosaic_0001>

<bundles_post_ra>
// kernel: tpu_custom_call.1
= control target key start
LH: loop header
LB: loop body
LE: loop exit
PB: predicated region body
PF: predicated region fallthrough
CT: control target
= control target key end

     0   :  { %8 = vsyncpa [#allocation3], 0  ;;  %s2239_s0 = inlined_call_operand.hbm [shape: f32[16,128], index: 0, kind: input, shape index: {}]   ;;  %s2240_s1 = inlined_call_operand.hbm [shape: f32[128,128], index: 1, kind: input, shape index: {}]   ;;  %s2241_s2 = inlined_call_operand.vmem [shape: f32[1,128], index: 2, kind: input, shape index: {}]   ;;  %s2242_s3 = inlined_call_operand.hbm [shape: f32[16,128], index: 3, kind: output, shape index: {}]  }
   0x1   :  { %10 = vsyncpa [#allocation3 + $0x1], 0 }
   0x2   :  { %11 = vsyncpa [#allocation6], 0 }
   0x3   :  { %12 = vsyncpa [#allocation4], 0 }
   0x4   :  { %14 = vsyncpa [#allocation4 + $0x1], 0  ;;  %s1763_s12 = smov 0   ;;  %s1765_s13 = smov 0  }
   0x5   :  { %s1767_s14 = smov 0   ;;  %s1769_s15 = smov 0  }
   0x6   :  { %s1771_s16 = smov 0   ;;  %s1773_s17 = smov 0  }
   0x7 LB: > { %s1026_s18 = sadd.s32 4294967295, %s1733_s17   ;;  %s1027_s19 = sadd.s32 4294967294, %s1733_s17   ;;  %s1733_s17 = sphi %s1773_s17, %s20_s17   ;;  %s1729_s16 = sphi %s1771_s16, %s2266_s16   ;;  %s1725_s15 = sphi %s1769_s15, %s2265_s15   ;;  %s1721_s14 = sphi %s1767_s14, %s2264_s14   ;;  %s1717_s13 = sphi %s1765_s13, %s2263_s13   ;;  %s1713_s12 = sphi %s1763_s12, %s2262_s12  }
   0x8   : > { %p52_p0 = scmp.ne.s32.totalorder %s1717_s13, %s1713_s12  ;;  %p1797_p1 = scmp.eq.s32.totalorder %s1026_s18, 0 }
   0x9   : > { %p1801_p2 = scmp.eq.s32.totalorder %s1026_s18, 1  ;;  %p136_p3 = scmp.eq.s32.totalorder %s1027_s19, 1 }
   0xa   : > { %s2247_s20 = scalar_select %p1797_p1, 1, 0 }
   0xb   : > { %s2248_s21 = scalar_select %p1801_p2, 1, 0 }
   0xc   : > { %p1807_p4 = por %p1797_p1, %p52_p0  ;;  %p1028_p5 = scmp.ge.s32.totalorder %s1733_s17, 1 }
   0xd   : > { %p1812_p6 = por %p136_p3, %p52_p0  ;;  %p143_p7 = scmp.lt.s32.totalorder %s1733_s17, 3 }
   0xe   : > { %s2249_s22 = scalar_select %p1807_p4, 1, 0 }
   0xf   : > { %s2250_s23 = scalar_select %p1812_p6, 1, 0 }
  0x10   : > { %p1817_p8 = pnand %p1028_p5, %p143_p7  ;;  %s1735_s25 = smov [#allocation5]  }
  0x11   : > { %s157_s26 = sshll.u32 %s1735_s25, 4  ;;  %s29_s28 = sadd.s32 1, %s1729_s16  ;;  %s158_s26 = int_to_ptr.vmem [resolvable:$true] %s157_s26 }
  0x12   : > { %s2251_s24 = scalar_select %p1817_p8, 1, 0 }
  0x13   : > { %p1517_p9 = pneg %p1817_p8  ;;  %s1589_s4 = scalar_lea.hbm %s2240_s1, 2048 }
  0x14   : > { %p1590_p12 = scmp.ne.s32.totalorder %s2240_s1, %s1589_s4  ;;  %p1596_p5 = scmp.lt.u32.totalorder %s1589_s4, %s2240_s1 }
  0x15   : > { %p1826_p11 = pnand %p1517_p9, %p1797_p1 }
  0x17   : > { %p1591_p13 = pneg %p1826_p11 }
  0x19   : > { %p1592_p0 = pnand %p1591_p13, %p1590_p12 }
  0x1b   : > { %p1593_p3 = pneg %p1592_p0 }
  0x1d   : > { %p1598_p7 = pnand %p1596_p5, %p1593_p3 }
  0x1f   : > { %1601 = shalt.err (!%p1598_p7)
}
  0x20   : > { %s1602_s9 = scalar_lea.vmem %s158_s26, 2048  ;;  %p1610_p1 = scmp.lt.s32.totalorder %s158_s26, %s158_s26 }
  0x21   : > { %p1603_p9 = scmp.ne.s32.totalorder %s158_s26, %s1602_s9  ;;  %p1611_p4 = scmp.lt.s32.totalorder %s1602_s9, %s1602_s9 }
  0x23   : > { %p1605_p10 = pnand %p1603_p9, %p1591_p13  ;;  %p1612_p8 = por %p1611_p4, %p1610_p1 }
  0x25   : > { %p1606_p6 = pneg %p1605_p10 }
  0x27   : > { %p1613_p2 = pnand %p1612_p8, %p1606_p6 }
  0x29   : > { %1616 = shalt.err (!%p1613_p2)
}
  0x2a   : > { %s1736_s10 = smov 128   ;;  %s1737_s11 = smov 8  }
  0x2b   : > { %1520 = dma.hbm_to_vmem [thread:$0]  (!%p1826_p11), %s2240_s1, 2048, %s158_s26, [#allocation6], %s1736_s10, %s1736_s10, %s1737_s11  }
  0x2c   : > { %p30_p1 = scmp.ge.s32.totalorder %s29_s28, 2  ;;  %s39_s25 = sadd.s32 1, %s1721_s14 }
  0x2d   : > { %p46_p2 = scmp.ne.s32.totalorder %s1721_s14, %s1717_s13  ;;  %p47_p4 = scmp.eq.s32.totalorder %s1733_s17, 0 }
  0x2e   : > { %s2268_s28 = smov (%p30_p1, %s29_s28), 0  ;;  %p2254_p8 = scmp.ne.s32.totalorder %s2248_s21, 0 }
  0x2f   : > { %p1853_p6 = por %p47_p4, %p46_p2  ;;  %s36_s27 = ssub.s32 %s1729_s16, %s2268_s28 }
  0x30   : > { %p1859_p10 = por %p2254_p8, %p46_p2  ;;  %p1530_p12 = scmp.lt.s32.totalorder %s1733_s17, 2 }
  0x31   : > { %p37_p11 = scmp.eq.s32.totalorder %s36_s27, 0  ;;  %s177_s26 = sand.u32 1, %s1721_s14  }
  0x32   : > { %s1032_s4 = sshll.u32 %s177_s26, 3  ;;  %s1033_s6 = sshll.u32 %s1729_s16, 7 }
  0x33   : > { %s1868_s5 = scalar_select %p37_p11, %s1721_s14, %s39_s25  }
  0x34   : > { %s1874_s9 = scalar_lea.hbm %s2239_s0, %s1033_s6  ;;  %s181_s21 = scalar_lea.vmem [#allocation2], %s1032_s4 }
  0x35   : > { %s188_s10 = sshll.u32 %s181_s21, 4  ;;  %p1880_p13 = pnand %p1530_p12, %p1853_p6  ;;  %s1876_s10 = int_to_ptr.vmem [resolvable:$true] %s188_s10 }
  0x36   : > { %s178_s18 = scalar_lea.sflag [#allocation3], %s177_s26  ;;  %s1617_s19 = scalar_lea.hbm %s1874_s9, 128 }
  0x37   : > { %p1618_p0 = scmp.ne.s32.totalorder %s1874_s9, %s1617_s19  ;;  %p1619_p3 = pneg %p1880_p13 }
  0x38   : > { %s1622_s4 = scalar_lea.hbm %s2239_s0, 256  ;;  %p1623_p9 = scmp.lt.u32.totalorder %s1874_s9, %s2239_s0 }
  0x39   : > { %p1620_p5 = pnand %p1619_p3, %p1618_p0  ;;  %p1624_p1 = scmp.lt.u32.totalorder %s1622_s4, %s1617_s19 }
  0x3a   : > { %p1626_p4 = scmp.lt.u32.totalorder %s1617_s19, %s1874_s9 }
  0x3b   : > { %p1621_p7 = pneg %p1620_p5  ;;  %p1625_p2 = por %p1624_p1, %p1623_p9 }
  0x3d   : > { %p1627_p6 = por %p1626_p4, %p1625_p2 }
  0x3f   : > { %p1628_p8 = pnand %p1627_p6, %p1621_p7 }
  0x41   : > { %1631 = shalt.err (!%p1628_p8)
}
  0x42   : > { %s1632_s26 = scalar_lea.vmem %s1876_s10, 128  ;;  %s1738_s7 = smov [#allocation2]  }
  0x43   : > { %p1633_p12 = scmp.ne.s32.totalorder %s1876_s10, %s1632_s26  ;;  %s1637_s8 = sshll.u32 %s1738_s7, 4  ;;  %s1638_s8 = int_to_ptr.vmem [resolvable:$false] %s1637_s8 }
  0x44   : > { %s1639_s21 = scalar_lea.vmem %s1638_s8, 256  ;;  %p1640_p5 = scmp.lt.s32.totalorder %s1876_s10, %s1638_s8 }
  0x45   : > { %p1635_p11 = pnand %p1633_p12, %p1619_p3  ;;  %p1641_p9 = scmp.lt.s32.totalorder %s1639_s21, %s1632_s26 }
  0x47   : > { %p1636_p0 = pneg %p1635_p11  ;;  %p1642_p1 = por %p1641_p9, %p1640_p5 }
  0x49   : > { %p1643_p2 = pnand %p1642_p1, %p1636_p0 }
  0x4b   : > { %1646 = shalt.err (!%p1643_p2)
}
  0x4c   : > { %1524 = dma.hbm_to_vmem [thread:$0]  (!%p1880_p13), %s1874_s9, 128, %s1876_s10, %s178_s18  }
  0x4d   : > { %p2257_p7 = scmp.ne.s32.totalorder %s2251_s24, 0 }
  0x4e   : > { %s1912_s19 = sand.u32 (!%p2257_p7), 1, %s1717_s13   ;;  %p2258_p3 = scmp.ne.s32.totalorder (!%p2257_p7), %s2249_s22, 0 }
  0x4f   : > { %197 = sbr.rel (%p2257_p7) target bundleno = 442 (0x1ba), region = 32  ;;  %s1035_s25 = sshll.u32 (!%p2257_p7), %s1912_s19, 3 }
  0x50   : > { %s200_s27 = scalar_lea.sflag (!%p2257_p7), [#allocation3], %s1912_s19  ;;  %s1918_s4 = scalar_lea.vmem (!%p2257_p7), [#allocation2], %s1035_s25 }
  0x56   : > { %1700 = dma.done.wait (%p2258_p3), %s200_s27, 128  }
  0x57   : > { %1702 = vsyncadd (%p2258_p3), %s200_s27, 4294967168  ;;  %p2259_p13 = scmp.ne.s32.totalorder %s2247_s20, 0 }
  0x59   : > { %1704 = dma.done.wait (%p2259_p13), [#allocation6], 2048  }
  0x5a   : > { %1706 = vsyncadd (%p2259_p13), [#allocation6], 4294965248  ;;  %v1739_v0 = vmov 0.0|0.0   ;;  %vm1740_vm0 = vmmov 0   ;;  %v1741_v1 = vmov 0.0   ;;  %v237_v2 = vld [vmem:[#allocation5] sm:$0xff] }
  0x5b   : > { %1355 = vmatprep.subr.bf16.mxu1 %v1739_v0  ;;  %1427 = vmatprep.subr.bf16.mxu0 %v1739_v0  ;;  %v238_v3 = vld [vmem:[#allocation5 + $0x8] sm:$0xff]  ;;  %v239_v4 = vld [vmem:[#allocation5 + $0x10] sm:$0xff]  ;;  %v261_v5 = vand.u32 4294901760, %v237_v2  ;;  %v240_v7 = vld [vmem:[#allocation5 + $0x18] sm:$0xff]  ;;  %s1040_s24 = sshll.u32 %s1725_s15, 7  ;;  %s232_s9 = scalar_lea.vmem [#allocation7], %s1035_s25 }
  0x5c   : > { %1177 = vmatprep.mubr.msk.f32.mxu1 %vm1740_vm0, %v1741_v1  ;;  %1282 = vmatprep.mubr.msk.f32.mxu0 %vm1740_vm0, %v1741_v1  ;;  %v264_v6 = vand.u32 4294901760, %v238_v3  ;;  %v267_v8 = vand.u32 4294901760, %v239_v4  ;;  %v270_v9 = vand.u32 4294901760, %v240_v7  ;;  %v241_v10 = vld [vmem:[#allocation5 + $0x20] sm:$0xff]  ;;  %v242_v11 = vld [vmem:[#allocation5 + $0x28] sm:$0xff]  ;;  %v243_v16 = vld [vmem:[#allocation5 + $0x30] sm:$0xff]  ;;  %s2190_s29 = scalar_lea.hbm %s2242_s3, %s1040_s24 }
  0x5d   : > { %v273_v14 = vand.u32 4294901760, %v241_v10  ;;  %v276_v15 = vand.u32 4294901760, %v242_v11  ;;  %v244_v17 = vld [vmem:[#allocation5 + $0x38] sm:$0xff]  ;;  %v279_v19 = vand.u32 4294901760, %v243_v16  ;;  %v1948_v21 = vld [vmem:[#allocation5 + $0x40] sm:$0xff]  ;;  %v1950_v22 = vld [vmem:[#allocation5 + $0x48] sm:$0xff]  ;;  %v1967_v29 = vsub.f32 %v237_v2, %v261_v5 }
  0x5e   : > { %v1934_v12 = vpack.c.bf16 %v264_v6, %v261_v5  ;;  %v1938_v13 = vpack.c.bf16 %v270_v9, %v267_v8  ;;  %v282_v20 = vand.u32 4294901760, %v244_v17  ;;  %v285_v24 = vand.u32 4294901760, %v1948_v21  ;;  %v1959_v26 = vld [vmem:[%s1918_s4] sm:$0xff]  ;;  %v1980_v35 = vld [vmem:[#allocation5 + $0x60] sm:$0xff]  ;;  %v1984_v36 = vld [vmem:[#allocation5 + $0x68] sm:$0xff]  ;;  %s923_s10 = sshll.u32 %s232_s9, 4  ;;  %s2192_s10 = int_to_ptr.vmem [resolvable:$true] %s923_s10 }
  0x5f   : > { %v1944_v18 = vpack.c.bf16 %v276_v15, %v273_v14  ;;  %v288_v25 = vand.u32 4294901760, %v1950_v22  ;;  %v1963_v27 = vld [vmem:[#allocation5 + $0x50] sm:$0xff]  ;;  %v1965_v28 = vld [vmem:[#allocation5 + $0x58] sm:$0xff]  ;;  %v1970_v30 = vand.u32 4294901760, %v1959_v26  ;;  %v1972_v31 = vsub.f32 %v238_v3, %v264_v6  ;;  %s909_s6 = scalar_lea.sflag [#allocation4], %s1912_s19  ;;  %s1647_s26 = scalar_lea.vmem %s2192_s10, 128 }
  0x60   : > { %1357 = vmatpush3.bf16.msra.mxu1 %v1934_v12  ;;  %1429 = vmatpush3.bf16.msra.mxu0 %v1934_v12  ;;  %v1954_v23 = vpack.c.bf16 %v282_v20, %v279_v19  ;;  %v291_v33 = vand.u32 4294901760, %v1963_v27  ;;  %v294_v34 = vand.u32 4294901760, %v1965_v28  ;;  %v1986_v37 = vsub.f32 %v239_v4, %v267_v8  ;;  %v2004_v43 = vld [vmem:[#allocation5 + $0x70] sm:$0xff]  ;;  %v2006_v44 = vld [vmem:[#allocation5 + $0x78] sm:$0xff]  ;;  %p1648_p4 = scmp.ne.s32.totalorder %s2192_s10, %s1647_s26  ;;  %s1742_s15 = smov [#allocation7]  }
  0x61   : > { %1358 = vmatprep.subr.bf16.mxu1 %v1739_v0  ;;  %1430 = vmatprep.subr.bf16.mxu0 %v1739_v0  ;;  %v1976_v32 = vpack.c.bf16 %v288_v25, %v285_v24  ;;  %v1988_v38 = vsub.f32 %v240_v7, %v270_v9  ;;  %v297_v39 = vand.u32 4294901760, %v1980_v35  ;;  %v1993_v40 = vsub.f32 %v1959_v26, %v1970_v30  ;;  %s1651_s7 = sshll.u32 %s1742_s15, 4  ;;  %s1652_s7 = int_to_ptr.vmem [resolvable:$false] %s1651_s7 }
  0x62   : > { %v2001_v41 = vpack.c.bf16 %v294_v34, %v291_v33  ;;  %v300_v42 = vand.u32 4294901760, %v1984_v36  ;;  %v354_v45 = vand.u32 4294901760, %v1967_v29  ;;  %v361_v46 = vand.u32 4294901760, %v1972_v31  ;;  %p1649_p6 = pnand %p1648_p4, %p1859_p10  ;;  %s1653_s8 = scalar_lea.vmem %s1652_s7, 256 }
  0x63   : > { %v2012_v47 = vsub.f32 %v241_v10, %v273_v14  ;;  %v2014_v48 = vsub.f32 %v242_v11, %v276_v15  ;;  %v303_v49 = vand.u32 4294901760, %v2004_v43  ;;  %v306_v50 = vand.u32 4294901760, %v2006_v44  ;;  %p1654_p12 = scmp.lt.s32.totalorder %s2192_s10, %s1652_s7  ;;  %p1655_p11 = scmp.lt.s32.totalorder %s1653_s8, %s1647_s26 }
  0x64   : > { %1360 = vmatpush3.bf16.msra.mxu1 %v1938_v13  ;;  %1432 = vmatpush3.bf16.msra.mxu0 %v1938_v13  ;;  %v343_v51 = vand.u32 4294901760, %v1993_v40  ;;  %v368_v52 = vand.u32 4294901760, %v1986_v37  ;;  %v2026_v53 = vpack.c.bf16 %v300_v42, %v297_v39  ;;  %v355_v54 = vsub.f32 %v1967_v29, %v354_v45  ;;  %p1650_p8 = pneg %p1649_p6 }
  0x65   : > { %1361 = vmatprep.subr.bf16.mxu1 %v1739_v0  ;;  %1433 = vmatprep.subr.bf16.mxu0 %v1739_v0  ;;  %v362_v55 = vsub.f32 %v1972_v31, %v361_v46  ;;  %v375_v56 = vand.u32 4294901760, %v1988_v38  ;;  %v2033_v57 = vsub.f32 %v243_v16, %v279_v19  ;;  %v2035_v58 = vsub.f32 %v244_v17, %v282_v20  ;;  %p1656_p0 = por %p1655_p11, %p1654_p12 }
  0x66   : > { %v344_v59 = vsub.f32 %v1993_v40, %v343_v51  ;;  %v369_v60 = vsub.f32 %v1986_v37, %v368_v52  ;;  %v382_v61 = vand.u32 4294901760, %v2012_v47  ;;  %v389_v62 = vand.u32 4294901760, %v2014_v48 }
  0x67   : > { %v2047_v63 = vpack.c.bf16 %v306_v50, %v303_v49  ;;  %v356_v2 = vand.u32 4294901760, %v355_v54  ;;  %v363_v3 = vand.u32 4294901760, %v362_v55  ;;  %v376_v4 = vsub.f32 %v1988_v38, %v375_v56  ;;  %p1657_p5 = pnand %p1656_p0, %p1650_p8 }
  0x68   : > { %1363 = vmatpush3.bf16.msra.mxu1 %v1944_v18  ;;  %1435 = vmatpush3.bf16.msra.mxu0 %v1944_v18  ;;  %v2053_v5 = vsub.f32 %v1948_v21, %v285_v24  ;;  %v2056_v6 = vsub.f32 %v1950_v22, %v288_v25  ;;  %v1452_v7 = vpack.c.bf16 %v361_v46, %v354_v45  ;;  %v345_v8 = vand.u32 4294901760, %v344_v59 }
  0x69   : > { %1364 = vmatprep.subr.bf16.mxu1 %v1739_v0  ;;  %1436 = vmatprep.subr.bf16.mxu0 %v1739_v0  ;;  %v370_v9 = vand.u32 4294901760, %v369_v60  ;;  %v383_v10 = vsub.f32 %v2012_v47, %v382_v61  ;;  %v390_v11 = vsub.f32 %v2014_v48, %v389_v62  ;;  %v1380_v14 = vpack.c.bf16 %v363_v3, %v356_v2 }
  0x6a   : > { %v377_v15 = vand.u32 4294901760, %v376_v4  ;;  %v396_v16 = vand.u32 4294901760, %v2033_v57  ;;  %v403_v17 = vand.u32 4294901760, %v2035_v58  ;;  %v2069_v19 = vsub.f32 %v1963_v27, %v291_v33 }
  0x6b   : > { %v2074_v20 = vsub.f32 %v1965_v28, %v294_v34  ;;  %v1455_v21 = vpack.c.bf16 %v375_v56, %v368_v52  ;;  %v384_v22 = vand.u32 4294901760, %v383_v10  ;;  %v391_v24 = vand.u32 4294901760, %v390_v11 }
  0x6c   : > { %1366 = vmatpush3.bf16.msra.mxu1 %v1954_v23  ;;  %1438 = vmatpush3.bf16.msra.mxu0 %v1954_v23  ;;  %v410_v25 = vand.u32 4294901760, %v2053_v5  ;;  %v1383_v45 = vpack.c.bf16 %v377_v15, %v370_v9  ;;  %v397_v46 = vsub.f32 %v2033_v57, %v396_v16  ;;  %v404_v27 = vsub.f32 %v2035_v58, %v403_v17 }
  0x6d   : > { %1367 = vmatprep.subr.bf16.mxu1 %v1739_v0  ;;  %1439 = vmatprep.subr.bf16.mxu0 %v1739_v0  ;;  %v417_v33 = vand.u32 4294901760, %v2056_v6  ;;  %v2085_v28 = vsub.f32 %v1980_v35, %v297_v39  ;;  %v2090_v34 = vsub.f32 %v1984_v36, %v300_v42  ;;  %v1458_v52 = vpack.c.bf16 %v389_v62, %v382_v61 }
  0x6e   : > { %v411_v54 = vsub.f32 %v2053_v5, %v410_v25  ;;  %v424_v55 = vand.u32 4294901760, %v2069_v19  ;;  %v398_v35 = vand.u32 4294901760, %v397_v46  ;;  %v405_v39 = vand.u32 4294901760, %v404_v27 }
  0x6f   : > { %v418_v56 = vsub.f32 %v2056_v6, %v417_v33  ;;  %v431_v36 = vand.u32 4294901760, %v2074_v20  ;;  %v2105_v42 = vsub.f32 %v2004_v43, %v303_v49  ;;  %v2110_v59 = vsub.f32 %v2006_v44, %v306_v50 }
  0x70   : > { %1369 = vmatpush3.bf16.msra.mxu1 %v1976_v32  ;;  %1441 = vmatpush3.bf16.msra.mxu0 %v1976_v32  ;;  %v1461_v60 = vpack.c.bf16 %v403_v17, %v396_v16  ;;  %v412_v61 = vand.u32 4294901760, %v411_v54  ;;  %v425_v62 = vsub.f32 %v2069_v19, %v424_v55  ;;  %v438_v2 = vand.u32 4294901760, %v2085_v28 }
  0x71   : > { %1370 = vmatprep.subr.bf16.mxu1 %v1739_v0  ;;  %1442 = vmatprep.subr.bf16.mxu0 %v1739_v0  ;;  %v1389_v3 = vpack.c.bf16 %v405_v39, %v398_v35  ;;  %v419_v4 = vand.u32 4294901760, %v418_v56  ;;  %v445_v43 = vand.u32 4294901760, %v2090_v34  ;;  %v1464_v44 = vpack.c.bf16 %v417_v33, %v410_v25 }
  0x72   : > { %v426_v49 = vand.u32 4294901760, %v425_v62  ;;  %v439_v50 = vsub.f32 %v2085_v28, %v438_v2  ;;  %v1467_v15 = vpack.c.bf16 %v431_v36, %v424_v55  ;;  %v1407_v54 = vpack.c.bf16 %v1988_v38, %v1986_v37 }
  0x73   : > { %v1392_v9 = vpack.c.bf16 %v419_v4, %v412_v61  ;;  %v446_v11 = vsub.f32 %v2090_v34, %v445_v43 }
  0x74   : > { %1372 = vmatpush3.bf16.msra.mxu1 %v2001_v41  ;;  %1444 = vmatpush3.bf16.msra.mxu0 %v2001_v41  ;;  %v440_v16 = vand.u32 4294901760, %v439_v50 }
  0x75   : > { %1373 = vmatprep.subr.bf16.mxu1 %v1739_v0  ;;  %1445 = vmatprep.subr.bf16.mxu0 %v1739_v0 }
  0x78   : > { %1375 = vmatpush3.bf16.msra.mxu1 %v2026_v53  ;;  %1447 = vmatpush3.bf16.msra.mxu0 %v2026_v53 }
  0x79   : > { %1376 = vmatprep.subr.bf16.mxu1 %v1739_v0  ;;  %1448 = vmatprep.subr.bf16.mxu0 %v1739_v0 }
  0x7c   : > { %1378 = vmatpush3.bf16.msra.mxu1 %v2047_v63  ;;  %1450 = vmatpush3.bf16.msra.mxu0 %v2047_v63 }
  0x7d   : > { %1379 = vmatprep.subr.bf16.mxu1 %v1739_v0  ;;  %1451 = vmatprep.subr.bf16.mxu0 %v1739_v0 }
  0x7f   : > { %1178 = vmatmul.mubr.f32.vlgmr.msra.gmra.mrb[0].mxu1 %v345_v8  ;;  %1283 = vmatmul.mubr.f32.vlgmr.msra.gmra.mrb[0].mxu0 %v343_v51  ;;  %v1386_v51 = vpack.c.bf16 %v391_v24, %v384_v22  ;;  %v452_v8 = vand.u32 4294901760, %v2105_v42 }
  0x80   : > { %1381 = vmatpush3.bf16.msra.mxu1 %v1380_v14  ;;  %1453 = vmatpush3.bf16.msra.mxu0 %v1452_v7  ;;  %v432_v7 = vsub.f32 %v2074_v20, %v431_v36  ;;  %v459_v14 = vand.u32 4294901760, %v2110_v59 }
  0x81   : > { %1382 = vmatprep.subr.bf16.mxu1 %v1739_v0  ;;  %1454 = vmatprep.subr.bf16.mxu0 %v1739_v0  ;;  %v453_v22 = vsub.f32 %v2105_v42, %v452_v8 }
  0x82   : > { %1212 = vmatprep.mubr.msk.f32.mxu1 %vm1740_vm0, %v1741_v1  ;;  %1317 = vmatprep.mubr.msk.f32.mxu0 %vm1740_vm0, %v1741_v1  ;;  %v433_v10 = vand.u32 4294901760, %v432_v7  ;;  %v460_v24 = vsub.f32 %v2110_v59, %v459_v14 }
  0x83   : > { %v454_v46 = vand.u32 4294901760, %v453_v22 }
  0x84   : > { %1384 = vmatpush3.bf16.msra.mxu1 %v1383_v45  ;;  %1456 = vmatpush3.bf16.msra.mxu0 %v1455_v21  ;;  %v1395_v17 = vpack.c.bf16 %v433_v10, %v426_v49  ;;  %v447_v21 = vand.u32 4294901760, %v446_v11  ;;  %v1470_v45 = vpack.c.bf16 %v445_v43, %v438_v2  ;;  %v461_v27 = vand.u32 4294901760, %v460_v24 }
  0x85   : > { %1385 = vmatprep.subr.bf16.mxu1 %v1739_v0  ;;  %1457 = vmatprep.subr.bf16.mxu0 %v1739_v0 }
  0x86   : > { %v1398_v25 = vpack.c.bf16 %v447_v21, %v440_v16  ;;  %v1401_v33 = vpack.c.bf16 %v461_v27, %v454_v46 }
  0x88   : > { %1387 = vmatpush3.bf16.msra.mxu1 %v1386_v51  ;;  %1459 = vmatpush3.bf16.msra.mxu0 %v1458_v52  ;;  %v1473_v51 = vpack.c.bf16 %v459_v14, %v452_v8  ;;  %v1404_v52 = vpack.c.bf16 %v1972_v31, %v1967_v29  ;;  %v1410_v29 = vpack.c.bf16 %v2014_v48, %v2012_v47  ;;  %v1038_v31 = vld [vmem:[%s2241_s2] ss:$0 sm:$0xff] }
  0x89   : > { %1388 = vmatprep.subr.bf16.mxu1 %v1739_v0  ;;  %1460 = vmatprep.subr.bf16.mxu0 %v1739_v0 }
  0x8c   : > { %1390 = vmatpush3.bf16.msra.mxu1 %v1389_v3  ;;  %1462 = vmatpush3.bf16.msra.mxu0 %v1461_v60 }
  0x8d   : > { %1391 = vmatprep.subr.bf16.mxu1 %v1739_v0  ;;  %1463 = vmatprep.subr.bf16.mxu0 %v1739_v0 }
  0x90   : > { %1393 = vmatpush3.bf16.msra.mxu1 %v1392_v9  ;;  %1465 = vmatpush3.bf16.msra.mxu0 %v1464_v44 }
  0x91   : > { %1394 = vmatprep.subr.bf16.mxu1 %v1739_v0  ;;  %1466 = vmatprep.subr.bf16.mxu0 %v1739_v0 }
  0x94   : > { %1396 = vmatpush3.bf16.msra.mxu1 %v1395_v17  ;;  %1468 = vmatpush3.bf16.msra.mxu0 %v1467_v15 }
  0x95   : > { %1397 = vmatprep.subr.bf16.mxu1 %v1739_v0  ;;  %1469 = vmatprep.subr.bf16.mxu0 %v1739_v0 }
  0x98   : > { %1399 = vmatpush3.bf16.msra.mxu1 %v1398_v25  ;;  %1471 = vmatpush3.bf16.msra.mxu0 %v1470_v45 }
  0x99   : > { %1400 = vmatprep.subr.bf16.mxu1 %v1739_v0  ;;  %1472 = vmatprep.subr.bf16.mxu0 %v1739_v0 }
  0x9c   : > { %1402 = vmatpush3.bf16.msra.mxu1 %v1401_v33  ;;  %1474 = vmatpush3.bf16.msra.mxu0 %v1473_v51 }
  0x9d   : > { %1403 = vmatprep.subr.bf16.mxu1 %v1739_v0  ;;  %1475 = vmatprep.subr.bf16.mxu0 %v1739_v0 }
  0x9f   : > { %1213 = vmatmul.mubr.f32.vlgmr.msra.gmra.mrb[0].mxu1 %v1970_v30  ;;  %1318 = vmatmul.mubr.f32.vlgmr.msra.gmra.mrb[0].mxu0 %v1970_v30 }
  0xa0   : > { %1405 = vmatpush3.bf16.msra.mxu1 %v1404_v52  ;;  %1477 = vmatpush3.bf16.msra.mxu0 %v1934_v12  ;;  %v1413_v12 = vpack.c.bf16 %v2035_v58, %v2033_v57 }
  0xa1   : > { %1406 = vmatprep.subr.bf16.mxu1 %v1739_v0  ;;  %1478 = vmatprep.subr.bf16.mxu0 %v1739_v0 }
  0xa2   : > { %1247 = vmatprep.mubr.msk.f32.mxu1 %vm1740_vm0, %v1741_v1  ;;  %1352 = vmatprep.mubr.msk.f32.mxu0 %vm1740_vm0, %v1741_v1  ;;  %v1416_v1 = vpack.c.bf16 %v2056_v6, %v2053_v5 }
  0xa4   : > { %1408 = vmatpush3.bf16.msra.mxu1 %v1407_v54  ;;  %1480 = vmatpush3.bf16.msra.mxu0 %v1938_v13  ;;  %v1419_v13 = vpack.c.bf16 %v2074_v20, %v2069_v19 }
  0xa5   : > { %1409 = vmatprep.subr.bf16.mxu1 %v1739_v0  ;;  %1481 = vmatprep.subr.bf16.mxu0 %v1739_v0 }
  0xa8   : > { %1411 = vmatpush3.bf16.msra.mxu1 %v1410_v29  ;;  %1483 = vmatpush3.bf16.msra.mxu0 %v1944_v18  ;;  %v1422_v18 = vpack.c.bf16 %v2090_v34, %v2085_v28 }
  0xa9   : > { %1412 = vmatprep.subr.bf16.mxu1 %v1739_v0  ;;  %1484 = vmatprep.subr.bf16.mxu0 %v1739_v0 }
  0xac   : > { %1414 = vmatpush3.bf16.msra.mxu1 %v1413_v12  ;;  %1486 = vmatpush3.bf16.msra.mxu0 %v1954_v23  ;;  %v1425_v23 = vpack.c.bf16 %v2110_v59, %v2105_v42 }
  0xad   : > { %1415 = vmatprep.subr.bf16.mxu1 %v1739_v0  ;;  %1487 = vmatprep.subr.bf16.mxu0 %v1739_v0 }
  0xb0   : > { %1417 = vmatpush3.bf16.msra.mxu1 %v1416_v1  ;;  %1489 = vmatpush3.bf16.msra.mxu0 %v1976_v32 }
  0xb1   : > { %1418 = vmatprep.subr.bf16.mxu1 %v1739_v0  ;;  %1490 = vmatprep.subr.bf16.mxu0 %v1739_v0 }
  0xb4   : > { %1420 = vmatpush3.bf16.msra.mxu1 %v1419_v13  ;;  %1492 = vmatpush3.bf16.msra.mxu0 %v2001_v41 }
  0xb5   : > { %1421 = vmatprep.subr.bf16.mxu1 %v1739_v0  ;;  %1493 = vmatprep.subr.bf16.mxu0 %v1739_v0 }
  0xb8   : > { %1423 = vmatpush3.bf16.msra.mxu1 %v1422_v18  ;;  %1495 = vmatpush3.bf16.msra.mxu0 %v2026_v53 }
  0xb9   : > { %1424 = vmatprep.subr.bf16.mxu1 %v1739_v0  ;;  %1496 = vmatprep.subr.bf16.mxu0 %v1739_v0 }
  0xbc   : > { %1426 = vmatpush3.bf16.msra.mxu1 %v1425_v23  ;;  %1498 = vmatpush3.bf16.msra.mxu0 %v2047_v63 }
  0xbf   : > { %1248 = vmatmul.mubr.f32.vlgmr.msra.gmra.mrb[0].mxu1 %v1993_v40  ;;  %1353 = vmatmul.mubr.f32.vlgmr.msra.gmra.mrb[0].mxu0 %v1970_v30 }
 0x192   : > { %v602_v32 = vpop.f32.mrb[0].mxu1  ;;  %v897_v37 = vpop.f32.mrb[0].mxu0 }
 0x193   : > { %v1499_v38 = vadd.f32 %v1038_v31, %v602_v32  ;;  %v1249_v41 = vpop.f32.mrb[1].mxu1  ;;  %v1354_v47 = vpop.f32.mrb[1].mxu0 }
 0x195   : > { %v1500_v0 = vadd.f32 %v1499_v38, %v897_v37 }
 0x197   : > { %v901_v48 = vmul.f32 0.5, %v1500_v0 }
 0x199   : > { %1587 = vtanh.f32 %v901_v48 }
 0x1a3   : > { %v1588_v53 = vpop.eup %1587 }
 0x1a4   : > { %v903_v57 = vmul.f32 0.5, %v1588_v53 }
 0x1a6   : > { %v904_v58 = vadd.f32 0.5, %v903_v57 }
 0x1a8   : > { %v905_v30 = vmul.f32 %v1500_v0, %v904_v58 }
 0x1aa   : > { %v906_v40 = vadd.f32 %v905_v30, %v1959_v26 }
 0x1ac   : > { %907 = vst [vmem:[%s232_s9] sm:$0xff] %v906_v40 }
 0x1ad   : > { %1660 = shalt.err (!%p1657_p5)
}
 0x1ae   : > { %s1661_s21 = scalar_lea.hbm %s2190_s29, 128  ;;  %s1665_s27 = scalar_lea.hbm %s2242_s3, 256 }
 0x1af   : > { %p1662_p9 = scmp.ne.s32.totalorder %s2190_s29, %s1661_s21  ;;  %p1666_p7 = scmp.lt.u32.totalorder %s2190_s29, %s2242_s3 }
 0x1b0   : > { %p1667_p3 = scmp.lt.u32.totalorder %s1665_s27, %s1661_s21  ;;  %p1669_p4 = scmp.lt.u32.totalorder %s1661_s21, %s2190_s29 }
 0x1b1   : > { %p1663_p1 = pnand %p1662_p9, %p1859_p10 }
 0x1b2   : > { %p1668_p13 = por %p1667_p3, %p1666_p7 }
 0x1b3   : > { %p1664_p2 = pneg %p1663_p1 }
 0x1b4   : > { %p1670_p6 = por %p1669_p4, %p1668_p13 }
 0x1b6   : > { %p1671_p8 = pnand %p1670_p6, %p1664_p2 }
 0x1b8   : > { %1674 = shalt.err (!%p1671_p8)
}
 0x1b9   : > { %1515 = dma.vmem_to_hbm [thread:$0]  (%p1859_p10), %s2192_s10, 128, %s2190_s29, %s909_s6  }
 0x1ba PF: > { %s935_s22 = sand.u32 1, %s1713_s12   ;;  %p2260_p12 = scmp.ne.s32.totalorder %s2250_s23, 0 }
 0x1bb   : > { %p2261_p11 = scmp.ge.s32.totalorder %s1733_s17, 2  ;;  %s936_s24 = scalar_lea.sflag [#allocation4], %s935_s22 }
 0x1bd   : > { %p1526_p0 = pnand %p2261_p11, %p2260_p12 }
 0x1bf   : > { %1708 = dma.done.wait (!%p1526_p0), %s936_s24, 128  }
 0x1c0   : > { %1710 = vsyncadd (!%p1526_p0), %s936_s24, 4294967168  ;;  %s20_s17 = sadd.s32 1, %s1733_s17   ;;  %s2262_s12 = smov %s1717_s13 }
 0x1c1   : > { %p17_p5 = scmp.ge.s32.totalorder %s20_s17, 4   ;;  %s2263_s13 = smov %s1721_s14 }
 0x1c2   : > { %s2264_s14 = smov %s1868_s5  ;;  %s2265_s15 = smov %s1729_s16 }
 0x1c3   : > { %s2266_s16 = smov %s2268_s28  ;;  %19 = sbr.rel (!%p17_p5) target bundleno = 7 (0x7), region = 85 }
 0x1ca   :  { %941 = vsyncpa [#allocation3], 1 }
 0x1cb   :  { %943 = vsyncpa [#allocation3 + $0x1], 1 }
 0x1cc   :  { %944 = vsyncpa [#allocation6], 1 }
 0x1cd   :  { %945 = vsyncpa [#allocation4], 1 }
 0x1ce   :  { %947 = vsyncpa [#allocation4 + $0x1], 1 }

</bundles_post_ra>
